<compile_context>
chip_gen: v7x
topology: tpu7x:2x2x1
jax: 0.10.0
libtpu: 0.0.40
codegen_flags: <defaults>
</compile_context>

<pallas_src>
import jax
import jax.numpy as jnp
from jax.experimental import pallas as pl
from jax.experimental.pallas import tpu as pltpu

LRELU_SLOPE = 0.1


# ----------------------------- Pallas kernels -----------------------------

def _stft_mag_kernel(frames_ref, basis_ref, o_ref):
    # frames: [MT, n_fft]; basis: [n_fft, 2*nb_pad] = [win*cos | -win*sin] (lane-padded)
    nb = o_ref.shape[-1]
    ri = jnp.dot(frames_ref[...], basis_ref[...],
                 preferred_element_type=jnp.float32)          # [MT, 2*nb_pad], one MXU pass
    re = ri[:, :nb]
    im = ri[:, nb:]
    # clamp the power (squared magnitude) at 1e-8, then sqrt — matches
    # torch.sqrt(torch.clamp(real**2 + imag**2, min=1e-8))
    o_ref[...] = jnp.sqrt(jnp.maximum(re * re + im * im, 1e-8))


def _make_conv_kernel(kh, kw, To, Cin, Cout, stride_w, fb, leaky):
    """Conv2d over a zero-padded input.  One block of `fb` output freq-rows per grid step.

    Per output row: build an im2col patch [To, kh*kw*Cin] (kh*kw shifted/strided slices
    concatenated on the channel/lane axis) and do a single matmul against the fused
    weight matrix [kh*kw*Cin, Cout].  Stride-2 layers use a native sublane-strided read.
    """
    def kernel(x_ref, w_ref, b_ref, o_ref):
        # x_ref: [Fp_pad, Tp, Cin] (whole padded sample, resident per batch index)
        # w_ref: [kh*kw*Cin, Cout]; b_ref: [1, Cout]; o_ref: [fb, To, Cout]
        f0 = pl.program_id(1) * fb
        wmat = w_ref[...]
        bias = b_ref[...]                                      # [1, Cout]
        for r in range(fb):                                    # static unroll
            pieces = []
            for dh in range(kh):
                fi = f0 + r + dh
                for dw in range(kw):
                    if stride_w == 1:
                        p = x_ref[fi, pl.ds(dw, To), :]                      # [To, Cin]
                    else:
                        p = x_ref[fi, pl.ds(dw, To, stride=stride_w), :]     # native stride
                    pieces.append(p)
            patch = jnp.concatenate(pieces, axis=-1)           # [To, kh*kw*Cin]
            acc = jnp.dot(patch, wmat,
                          preferred_element_type=jnp.float32)  # one fat-K MXU matmul
            acc = acc + bias
            if leaky:
                acc = jnp.where(acc > 0, acc, LRELU_SLOPE * acc)
            o_ref[r] = acc.astype(o_ref.dtype)
    return kernel


# ----------------------------- wrappers -----------------------------

def conv2d_pallas(x, w, b, *, stride_w=1, pad_hw=(1, 4), leaky=True, fb=8):
    """x: [B, F, T, Cin]; w: torch layout [Cout, Cin, kh, kw]; b: [Cout]."""
    B, F, T, Cin = x.shape
    Cout, _, kh, kw = w.shape
    ph, pw = pad_hw
    Fo = F + 2 * ph - kh + 1
    To = (T + 2 * pw - kw) // stride_w + 1                 # PyTorch Conv2d output length
    Fo_pad = ((Fo + fb - 1) // fb) * fb                    # pad F so grid blocks of fb fit
    Fp = Fo_pad + kh - 1
    Tp = T + 2 * pw

    # zero pad (Conv2d padding); extra bottom rows only feed the sliced-off output rows
    xp = jnp.pad(x, ((0, 0), (ph, Fp - F - ph), (pw, pw), (0, 0))).astype(jnp.float32)

    K = kh * kw * Cin
    # fuse taps into one [K, Cout] matrix in (dh, dw, cin) row order (matches concat order)
    wk = jnp.transpose(w, (2, 3, 1, 0)).reshape(K, Cout).astype(jnp.float32)
    bk = b.reshape(1, Cout).astype(jnp.float32)

    # TODO(synk): for full-length audio (n_fft 1024/2048, thousands of frames) the whole
    # padded sample no longer fits VMEM on v7x/v5e; switch in_specs[0] to memory_space=pl.ANY
    # and manually DMA an (fb+kh-1)-row halo window per grid step.
    kernel = _make_conv_kernel(kh, kw, To, Cin, Cout, stride_w, fb, leaky)
    y = pl.pallas_call(
        kernel,
        out_shape=jax.ShapeDtypeStruct((B, Fo_pad, To, Cout), jnp.float32),
        grid=(B, Fo_pad // fb),
        in_specs=[
            pl.BlockSpec((None, Fp, Tp, Cin), lambda bb, ff: (bb, 0, 0, 0)),
            pl.BlockSpec((K, Cout), lambda bb, ff: (0, 0)),
            pl.BlockSpec((1, Cout), lambda bb, ff: (0, 0)),
        ],
        out_specs=pl.BlockSpec((None, fb, To, Cout), lambda bb, ff: (bb, ff, 0, 0)),
        compiler_params=pltpu.CompilerParams(
            dimension_semantics=("parallel", "parallel")),   # no carry across either axis
    )(xp, wk, bk)

    return y[:, :Fo]                                         # drop the fb-padding rows


def stft_magnitude(y, n_fft, hop, win_length, *, mt=256):
    """torch.stft semantics: center=True reflect pad, hann(win_length) zero-padded
    (centered) to n_fft, onesided DFT, magnitude = sqrt(clamp(re^2+im^2, 1e-8)).
    y: [B, L] -> [B, n_fft//2+1, n_frames]."""
    B, L = y.shape
    pad = n_fft // 2
    yp = jnp.pad(y, ((0, 0), (pad, pad)), mode="reflect")
    Lp = L + 2 * pad
    n_frames = 1 + (Lp - n_fft) // hop
    idx = hop * jnp.arange(n_frames)[:, None] + jnp.arange(n_fft)[None, :]
    frames = yp[:, idx].reshape(B * n_frames, n_fft).astype(jnp.float32)

    # periodic hann window, zero-padded (centered) to n_fft, folded into the DFT basis
    n = jnp.arange(win_length, dtype=jnp.float32)
    win = 0.5 - 0.5 * jnp.cos(2.0 * jnp.pi * n / win_length)
    lpad = (n_fft - win_length) // 2
    win_full = jnp.pad(win, (lpad, n_fft - win_length - lpad))

    n_bins = n_fft // 2 + 1
    nb_pad = ((n_bins + 127) // 128) * 128                   # lane-dense output width
    kk = jnp.arange(n_bins, dtype=jnp.float32)[None, :]
    nn = jnp.arange(n_fft, dtype=jnp.float32)[:, None]
    ang = 2.0 * jnp.pi * nn * kk / n_fft
    cos_m = win_full[:, None] * jnp.cos(ang)
    sin_m = -win_full[:, None] * jnp.sin(ang)                # exp(-i 2*pi*n*k/N)
    zpad = jnp.zeros((n_fft, nb_pad - n_bins), jnp.float32)
    basis = jnp.concatenate([cos_m, zpad, sin_m, zpad], axis=1).astype(jnp.float32)

    # tile over frames (M) for pipelining + bounded VMEM
    M = B * n_frames
    mt = min(mt, ((M + 7) // 8) * 8)
    Mp = ((M + mt - 1) // mt) * mt
    frames_p = jnp.pad(frames, ((0, Mp - M), (0, 0)))

    # TODO(synk): on v6e/v7x the frames/basis can be cast to bfloat16 (keep f32 accumulate)
    # for ~2x MXU throughput once magnitude tolerance is validated.
    mag = pl.pallas_call(
        _stft_mag_kernel,
        out_shape=jax.ShapeDtypeStruct((Mp, nb_pad), jnp.float32),
        grid=(Mp // mt,),
        in_specs=[
            pl.BlockSpec((mt, n_fft), lambda i: (i, 0)),
            pl.BlockSpec((n_fft, 2 * nb_pad), lambda i: (0, 0)),   # basis resident
        ],
        out_specs=pl.BlockSpec((mt, nb_pad), lambda i: (i, 0)),
        compiler_params=pltpu.CompilerParams(dimension_semantics=("parallel",)),
    )(frames_p, basis)

    mag = mag[:M, :n_bins].reshape(B, n_frames, n_bins)
    return jnp.transpose(mag, (0, 2, 1))                     # [B, n_bins, n_frames]


# (stride_w, pad_hw, leaky) for the 5 discriminator convs + final `out` conv
_LAYER_CFG = [
    (1, (1, 4), True),
    (2, (1, 4), True),
    (2, (1, 4), True),
    (2, (1, 4), True),
    (1, (1, 1), True),
    (1, (1, 1), False),   # self.out: no activation
]
_LAYER_SHAPES = [(1, 32, 3, 9), (32, 32, 3, 9), (32, 32, 3, 9),
                 (32, 32, 3, 9), (32, 32, 3, 3), (32, 1, 3, 3)]  # (Cin, Cout, kh, kw)


def spec_discriminator_forward(x, layers, fft_size, hop, win_length):
    """x: [B, 1, L]  ->  (score [B, F*T], fmap list of NCHW arrays)."""
    B = x.shape[0]
    y = x[:, 0, :]                                            # squeeze(1)
    spec = stft_magnitude(y, fft_size, hop, win_length)       # [B, n_bins, n_frames]
    h = spec[:, :, :, None]                                   # [B, F, T, 1] channels-last
    fmap_cl = []
    for (w, b), (sw, pad, leaky) in zip(layers, _LAYER_CFG):
        h = conv2d_pallas(h, w, b, stride_w=sw, pad_hw=pad, leaky=leaky)
        fmap_cl.append(h)                                     # keep channels-last internally
    # transpose to NCHW only at the API boundary (one pass per returned tensor)
    fmap = [jnp.transpose(t, (0, 3, 1, 2)) for t in fmap_cl]
    score = fmap[-1].reshape(B, -1)                           # torch.flatten(y, 1, -1)
    return score, fmap


def multi_res_spec_discriminator_forward(x, params, fft_sizes, hop_sizes, win_lengths):
    scores, feats = [], []
    for layers, nfft, hop, win in zip(params, fft_sizes, hop_sizes, win_lengths):
        s, f = spec_discriminator_forward(x, layers, nfft, hop, win)
        scores.append(s)
        feats.append(f)
    return scores, feats


def init_params(key, num_discriminators=3):
    # Deterministic synthetic weights; weight_norm/spectral_norm are weight
    # re-parametrizations, so we initialize the effective conv weights directly.
    params = []
    for _ in range(num_discriminators):
        layers = []
        for (cin, cout, kh, kw) in _LAYER_SHAPES:
            key, k_w, k_b = jax.random.split(key, 3)
            w = jax.random.normal(k_w, (cout, cin, kh, kw), jnp.float32) * 0.05
            b = jax.random.normal(k_b, (cout,), jnp.float32) * 0.01
            layers.append((w, b))
        params.append(layers)
    return params


if __name__ == "__main__":
    key = jax.random.PRNGKey(0)
    k_x, k_p = jax.random.split(key)

    # Small, module-consistent config (constructor-configurable resolutions).
    B, L = 2, 256
    fft_sizes = [64, 128, 32]
    hop_sizes = [16, 32, 8]
    win_lengths = [32, 64, 16]

    x = jax.random.normal(k_x, (B, 1, L), jnp.float32)
    params = init_params(k_p)

    scores, feats = multi_res_spec_discriminator_forward(
        x, params, fft_sizes, hop_sizes, win_lengths)

    jax.block_until_ready((scores, feats))

    print("KERNEL_OK")
</pallas_src>

<mosaic_0001>
module attributes {stable_mosaic.version = 11 : i64} {
  func.func @_stft_mag_kernel(%arg0: i32, %arg1: memref<40x64xf32, #tpu.memory_space<vmem>>, %arg2: memref<64x256xf32, #tpu.memory_space<vmem>>, %arg3: memref<40x128xf32, #tpu.memory_space<vmem>>) attributes {dimension_semantics = [#tpu.dimension_semantics<parallel>], iteration_bounds = array<i64: 1>, scalar_prefetch = 0 : i64, scratch_operands = 0 : i64, tpu.core_type = #tpu.core_type<tc>, window_params = [{transform_indices = @transform_0, window_bounds = array<i64: 40, 64>}, {pipeline_mode = #tpu.pipeline_mode<synchronous>, transform_indices = @transform_1, window_bounds = array<i64: 64, 256>}, {transform_indices = @transform_2, window_bounds = array<i64: 40, 128>}]} {
    %c0 = arith.constant 0 : index
    %c0_0 = arith.constant 0 : index
    %0 = vector.load %arg1[%c0, %c0_0] : memref<40x64xf32, #tpu.memory_space<vmem>>, vector<40x64xf32>
    %c0_1 = arith.constant 0 : index
    %c0_2 = arith.constant 0 : index
    %1 = vector.load %arg2[%c0_1, %c0_2] : memref<64x256xf32, #tpu.memory_space<vmem>>, vector<64x256xf32>
    %cst = arith.constant dense<0.000000e+00> : vector<40x256xf32>
    %2 = tpu.matmul %0, %1, %cst {dimension_numbers = #tpu.dot_dimension_numbers<[1], [0], [0], [1], [0, 0, 1, 1], [], []>} : vector<40x64xf32>, vector<64x256xf32>, vector<40x256xf32> -> vector<40x256xf32>
    %3 = vector.extract_strided_slice %2 {offsets = [0, 0], sizes = [40, 128], strides = [1, 1]} : vector<40x256xf32> to vector<40x128xf32>
    %4 = vector.extract_strided_slice %2 {offsets = [0, 128], sizes = [40, 128], strides = [1, 1]} : vector<40x256xf32> to vector<40x128xf32>
    %5 = arith.mulf %3, %3 : vector<40x128xf32>
    %6 = arith.mulf %4, %4 : vector<40x128xf32>
    %7 = arith.addf %5, %6 : vector<40x128xf32>
    %cst_3 = arith.constant 9.99999993E-9 : f32
    %8 = vector.broadcast %cst_3 : f32 to vector<40x128xf32>
    %9 = arith.maximumf %7, %8 : vector<40x128xf32>
    %10 = math.sqrt %9 : vector<40x128xf32>
    %c0_4 = arith.constant 0 : index
    %c0_5 = arith.constant 0 : index
    %11 = vector.load %arg3[%c0_4, %c0_5] : memref<40x128xf32, #tpu.memory_space<vmem>>, vector<40x128xf32>
    tpu.vector_store %arg3[%c0_4, %c0_5], %10 {strides = array<i32>} : memref<40x128xf32, #tpu.memory_space<vmem>>, vector<40x128xf32>,
    return
  }
  func.func @transform_0(%arg0: i32) -> (i32, i32) {
    %c0_i32 = arith.constant 0 : i32
    %c0_i32_0 = arith.constant 0 : i32
    return %arg0, %c0_i32 : i32, i32
  }
  func.func @transform_1(%arg0: i32) -> (i32, i32) {
    %c0_i32 = arith.constant 0 : i32
    %c0_i32_0 = arith.constant 0 : i32
    %c0_i32_1 = arith.constant 0 : i32
    return %c0_i32, %c0_i32_0 : i32, i32
  }
  func.func @transform_2(%arg0: i32) -> (i32, i32) {
    %c0_i32 = arith.constant 0 : i32
    %c0_i32_0 = arith.constant 0 : i32
    return %arg0, %c0_i32 : i32, i32
  }
}

</mosaic_0001>

<bundles_post_ra>
// kernel: tpu_custom_call.1
= control target key start
LH: loop header
LB: loop body
LE: loop exit
PB: predicated region body
PF: predicated region fallthrough
CT: control target
= control target key end

     0   :  { %7 = vsyncpa [#allocation3], 0  ;;  %s434_s0 = inlined_call_operand.hbm [shape: f32[40,64], index: 0, kind: input, shape index: {}]   ;;  %s435_s1 = inlined_call_operand.hbm [shape: f32[64,256], index: 1, kind: input, shape index: {}]   ;;  %s436_s2 = inlined_call_operand.hbm [shape: f32[40,128], index: 2, kind: output, shape index: {}]  }
   0x1   :  { %8 = vsyncpa [#allocation6], 0 }
   0x2   :  { %9 = vsyncpa [#allocation4], 0  ;;  %s369_s9 = smov [#allocation2]   ;;  %s297_s13 = scalar_lea.hbm %s434_s0, 640 }
   0x3   :  { %s15_s10 = sshll.u32 %s369_s9, 4  ;;  %p298_p0 = scmp.ne.s32.totalorder %s434_s0, %s297_s13  ;;  %s16_s10 = int_to_ptr.vmem [resolvable:$true] %s15_s10 }
   0x4   :  { %p301_p1 = scmp.lt.u32.totalorder %s297_s13, %s434_s0 }
   0x6   :  { %p303_p2 = pnand %p301_p1, %p298_p0 }
   0x8   :  { %306 = shalt.err (!%p303_p2)
}
   0x9   :  { %s307_s18 = scalar_lea.vmem %s16_s10, 640  ;;  %p312_p4 = scmp.lt.s32.totalorder %s16_s10, %s16_s10 }
   0xa   :  { %p308_p3 = scmp.ne.s32.totalorder %s16_s10, %s307_s18  ;;  %p313_p5 = scmp.lt.s32.totalorder %s307_s18, %s307_s18 }
   0xc   :  { %p314_p6 = por %p313_p5, %p312_p4 }
   0xe   :  { %p315_p7 = pnand %p314_p6, %p308_p3 }
  0x10   :  { %318 = shalt.err (!%p315_p7)
}
  0x11   :  { %s370_s19 = smov 128   ;;  %s371_s20 = smov 8  }
  0x12   :  { %21 = dma.hbm_to_vmem [thread:$0]  %s434_s0, 640, %s16_s10, [#allocation3], %s370_s19, %s370_s19, %s371_s20  }
  0x13   :  { %s372_s23 = smov [#allocation5]   ;;  %s319_s27 = scalar_lea.hbm %s435_s1, 2048 }
  0x14   :  { %s27_s24 = sshll.u32 %s372_s23, 4  ;;  %p320_p8 = scmp.ne.s32.totalorder %s435_s1, %s319_s27  ;;  %s28_s24 = int_to_ptr.vmem [resolvable:$true] %s27_s24 }
  0x15   :  { %p323_p9 = scmp.lt.u32.totalorder %s319_s27, %s435_s1 }
  0x17   :  { %p325_p10 = pnand %p323_p9, %p320_p8 }
  0x19   :  { %328 = shalt.err (!%p325_p10)
}
  0x1a   :  { %s329_s4 = scalar_lea.vmem %s28_s24, 2048  ;;  %p334_p12 = scmp.lt.s32.totalorder %s28_s24, %s28_s24 }
  0x1b   :  { %p330_p11 = scmp.ne.s32.totalorder %s28_s24, %s329_s4  ;;  %p335_p13 = scmp.lt.s32.totalorder %s329_s4, %s329_s4 }
  0x1d   :  { %p336_p0 = por %p335_p13, %p334_p12 }
  0x1f   :  { %p337_p1 = pnand %p336_p0, %p330_p11 }
  0x21   :  { %340 = shalt.err (!%p337_p1)
}
  0x22   :  { %s373_s0 = smov 256   ;;  %s374_s5 = smov 16  }
  0x23   :  { %33 = dma.hbm_to_vmem [thread:$0]  %s435_s1, 2048, %s28_s24, [#allocation6], %s373_s0, %s373_s0, %s374_s5  }
  0x24   :  { %363 = dma.done.wait [#allocation3], 640  }
  0x25   :  { %364 = vsyncadd [#allocation3], 4294966656 }
  0x26   :  { %365 = dma.done.wait [#allocation6], 2048  }
  0x27   :  { %366 = vsyncadd [#allocation6], 4294965248  ;;  %v375_v0 = vmov 0.0   ;;  %v46_v1 = vld [vmem:[#allocation5 + $0x8] sm:$0xff]  ;;  %v48_v2 = vld [vmem:[#allocation5 + $0x18] sm:$0xff]  ;;  %vm61_vm0 = vcmask 523264  }
  0x28   :  { %141 = vmatprep.mubr.f32.mxu0 %v375_v0  ;;  %159 = vmatprep.mubr.f32.mxu1 %v375_v0  ;;  %v45_v3 = vld [vmem:[#allocation5] sm:$0xff]  ;;  %v255_v4 = vpack.c.bf16 %v48_v2, %v46_v1  ;;  %v47_v5 = vld [vmem:[#allocation5 + $0x10] sm:$0xff]  ;;  %v50_v6 = vld [vmem:[#allocation5 + $0x28] sm:$0xff]  ;;  %s376_s1 = smov [#allocation7]  }
  0x29   :  { %v52_v7 = vld [vmem:[#allocation5 + $0x38] sm:$0xff]  ;;  %v257_v8 = vpack.c.bf16 %v47_v5, %v45_v3  ;;  %v49_v10 = vld [vmem:[#allocation5 + $0x20] sm:$0xff]  ;;  %v51_v11 = vld [vmem:[#allocation5 + $0x30] sm:$0xff]  ;;  %s237_s8 = sshll.u32 %s376_s1, 4  ;;  %s238_s8 = int_to_ptr.vmem [resolvable:$true] %s237_s8 }
  0x2a   :  { %v259_v9 = vpack.c.bf16 %v52_v7, %v50_v6  ;;  %v54_v12 = vld [vmem:[#allocation5 + $0x48] sm:$0xff]  ;;  %256 = vmatprep.subr.bf16.mxu0 %v255_v4  ;;  %271 = vmatprep.subr.bf16.mxu1 %v255_v4  ;;  %v56_v13 = vld [vmem:[#allocation5 + $0x58] sm:$0xff]  ;;  %v261_v14 = vpack.c.bf16 %v51_v11, %v49_v10  ;;  %v53_v16 = vld [vmem:[#allocation5 + $0x40] sm:$0xff]  ;;  %s341_s9 = scalar_lea.vmem %s238_s8, 640  ;;  %p346_p3 = scmp.lt.s32.totalorder %s238_s8, %s238_s8 }
  0x2b   :  { %258 = vmatpush1.bf16.msra.mxu0 %v257_v8  ;;  %275 = vmatpush1.bf16.msra.mxu1 %v257_v8  ;;  %v263_v15 = vpack.c.bf16 %v56_v13, %v54_v12  ;;  %v55_v17 = vld [vmem:[#allocation5 + $0x50] sm:$0xff]  ;;  %v58_v18 = vld [vmem:[#allocation5 + $0x68] sm:$0xff]  ;;  %v60_v19 = vld [vmem:[#allocation5 + $0x78] sm:$0xff]  ;;  %p342_p2 = scmp.ne.s32.totalorder %s238_s8, %s341_s9  ;;  %p347_p4 = scmp.lt.s32.totalorder %s341_s9, %s341_s9 }
  0x2c   :  { %260 = vmatprep.subr.bf16.mxu0 %v259_v9  ;;  %272 = vmatprep.subr.bf16.mxu1 %v259_v9  ;;  %v265_v20 = vpack.c.bf16 %v55_v17, %v53_v16  ;;  %v267_v21 = vpack.c.bf16 %v60_v19, %v58_v18  ;;  %v57_v22 = vld [vmem:[#allocation5 + $0x60] sm:$0xff]  ;;  %v59_v23 = vld [vmem:[#allocation5 + $0x70] sm:$0xff]  ;;  %v40_v25 = vld [vmem:[#allocation2] sm:$0xff] }
  0x2d   :  { %v269_v24 = vpack.c.bf16 %v59_v23, %v57_v22  ;;  %v43_v26 = vld [vmem:[#allocation2 + $0x18] sm:$0xff]  ;;  %v41_v27 = vld [vmem:[#allocation2 + $0x8] sm:$0xff]  ;;  %v44_v28 = vld [vmem:[#allocation2 + $0x20] sm:$0xff]  ;;  %p348_p5 = por %p347_p4, %p346_p3 }
  0x2e   :  { %v42_v29 = vld [vmem:[#allocation2 + $0x10] sm:$0xff] }
  0x2f   :  { %262 = vmatpush1.bf16.msra.mxu0 %v261_v14  ;;  %276 = vmatpush1.bf16.msra.mxu1 %v261_v14  ;;  %p349_p6 = pnand %p348_p5, %p342_p2 }
  0x30   :  { %264 = vmatprep.subr.bf16.mxu0 %v263_v15  ;;  %273 = vmatprep.subr.bf16.mxu1 %v263_v15 }
  0x33   :  { %266 = vmatpush1.bf16.msra.mxu0 %v265_v20  ;;  %277 = vmatpush1.bf16.msra.mxu1 %v265_v20 }
  0x34   :  { %268 = vmatprep.subr.bf16.mxu0 %v267_v21  ;;  %274 = vmatprep.subr.bf16.mxu1 %v267_v21 }
  0x37   :  { %270 = vmatpush1.bf16.msra.mxu0 %v269_v24  ;;  %278 = vmatpush1.bf16.msra.mxu1 %v269_v24 }
  0x3a   :  { %250 = vmatmul.mubr.msk.f32.vlgmr.msra.gmra.mrb[0].mxu0 %vm61_vm0, %v40_v25  ;;  %253 = vmatmul.mubr.msk.f32.vlgmr.msra.gmra.mrb[0].mxu1 %vm61_vm0, %v43_v26 }
  0x3b   :  { %147 = vmatprep.mubr.f32.mxu0 %v375_v0  ;;  %165 = vmatprep.mubr.f32.mxu1 %v375_v0 }
  0x3e   :  { %251 = vmatmul.mubr.msk.f32.gmra.mrb[2].mxu0 %vm61_vm0, %v41_v27  ;;  %254 = vmatmul.mubr.msk.f32.gmra.mrb[2].mxu1 %vm61_vm0, %v44_v28 }
  0x3f   :  { %153 = vmatprep.mubr.f32.mxu0 %v375_v0 }
  0x42   :  { %252 = vmatmul.mubr.msk.f32.gmra.mrb[4].mxu0 %vm61_vm0, %v42_v29 }
 0x10d   :  { %v143_v30 = vpop.f32.mrb[0].mxu0  ;;  %v161_v31 = vpop.f32.mrb[0].mxu1 }
 0x10e   :  { %v172_v32 = vmul.f32 %v143_v30, %v143_v30  ;;  %v175_v33 = vmul.f32 %v161_v31, %v161_v31  ;;  %v145_v34 = vpop.f32.mrb[1].mxu0  ;;  %v163_v35 = vpop.f32.mrb[1].mxu1 }
 0x10f   :  { %v177_v36 = vmul.f32 %v145_v34, %v145_v34  ;;  %v180_v37 = vmul.f32 %v163_v35, %v163_v35 }
 0x111   :  { %v182_v38 = vadd.f32 %v177_v36, %v172_v32  ;;  %v185_v39 = vadd.f32 %v180_v37, %v175_v33  ;;  %v149_v40 = vpop.f32.mrb[2].mxu0  ;;  %v167_v41 = vpop.f32.mrb[2].mxu1 }
 0x112   :  { %v173_v42 = vmul.f32 %v149_v40, %v149_v40  ;;  %v176_v43 = vmul.f32 %v167_v41, %v167_v41  ;;  %v151_v44 = vpop.f32.mrb[3].mxu0  ;;  %v169_v45 = vpop.f32.mrb[3].mxu1 }
 0x113   :  { %v187_v46 = vmax.f32 %v182_v38, 1e-08  ;;  %v190_v47 = vmax.f32 %v185_v39, 1e-08  ;;  %v178_v48 = vmul.f32 %v151_v44, %v151_v44  ;;  %v181_v49 = vmul.f32 %v169_v45, %v169_v45 }
 0x115   :  { %287 = vrsqrt.f32 %v187_v46  ;;  %v183_v50 = vadd.f32 %v178_v48, %v173_v42  ;;  %v186_v51 = vadd.f32 %v181_v49, %v176_v43  ;;  %v155_v52 = vpop.f32.mrb[4].mxu0  ;;  %vm194_vm1 = vcmp.eq.f32.partialorder %v187_v46, inf }
 0x116   :  { %289 = vrsqrt.f32 %v190_v47  ;;  %v174_v53 = vmul.f32 %v155_v52, %v155_v52  ;;  %v157_v54 = vpop.f32.mrb[5].mxu0  ;;  %v197_v63 = vand.u32 2147483648, %v187_v46  ;;  %vm196_vm2 = vcmp.eq.f32.partialorder %v187_v46, 0.0 }
 0x117   :  { %v188_v55 = vmax.f32 %v183_v50, 1e-08  ;;  %v191_v56 = vmax.f32 %v186_v51, 1e-08  ;;  %v179_v57 = vmul.f32 %v157_v54, %v157_v54  ;;  %vm215_vm3 = vcmp.eq.f32.partialorder %v190_v47, inf }
 0x118   :  { %v218_v2 = vand.u32 2147483648, %v190_v47  ;;  %vm217_vm4 = vcmp.eq.f32.partialorder %v190_v47, 0.0 }
 0x119   :  { %291 = vrsqrt.f32 %v188_v55  ;;  %v184_v58 = vadd.f32 %v179_v57, %v174_v53  ;;  %vm201_vm5 = vcmp.eq.f32.partialorder %v188_v55, inf  ;;  %v204_v9 = vand.u32 2147483648, %v188_v55 }
 0x11a   :  { %293 = vrsqrt.f32 %v191_v56  ;;  %vm203_vm6 = vcmp.eq.f32.partialorder %v188_v55, 0.0  ;;  %vm222_vm7 = vcmp.eq.f32.partialorder %v191_v56, inf  ;;  %v225_v12 = vand.u32 2147483648, %v191_v56 }
 0x11b   :  { %v189_v59 = vmax.f32 %v184_v58, 1e-08  ;;  %vm224_vm8 = vcmp.eq.f32.partialorder %v191_v56, 0.0 }
 0x11d   :  { %295 = vrsqrt.f32 %v189_v59  ;;  %vm208_vm9 = vcmp.eq.f32.partialorder %v189_v59, inf  ;;  %v211_v18 = vand.u32 2147483648, %v189_v59  ;;  %vm210_vm10 = vcmp.eq.f32.partialorder %v189_v59, 0.0 }
 0x11f   :  { %v288_v60 = vpop.eup %287 }
 0x120   :  { %v290_v61 = vpop.eup %289  ;;  %v193_v62 = vmul.f32 %v288_v60, %v187_v46 }
 0x121   :  { %v214_v0 = vmul.f32 %v290_v61, %v190_v47 }
 0x122   :  { %v195_v1 = vsel %vm194_vm1, %v187_v46, %v193_v62 }
 0x123   :  { %v292_v3 = vpop.eup %291  ;;  %v198_v4 = vsel %vm196_vm2, %v197_v63, %v195_v1  ;;  %v216_v5 = vsel %vm215_vm3, %v190_v47, %v214_v0 }
 0x124   :  { %v294_v6 = vpop.eup %293  ;;  %v200_v7 = vmul.f32 %v292_v3, %v188_v55  ;;  %v219_v8 = vsel %vm217_vm4, %v218_v2, %v216_v5  ;;  %227 = vst [vmem:[#allocation7] sm:$0xff] %v198_v4 }
 0x125   :  { %v221_v10 = vmul.f32 %v294_v6, %v191_v56  ;;  %230 = vst [vmem:[#allocation7 + $0x18] sm:$0xff] %v219_v8 }
 0x126   :  { %v202_v11 = vsel %vm201_vm5, %v188_v55, %v200_v7 }
 0x127   :  { %v296_v13 = vpop.eup %295  ;;  %v205_v14 = vsel %vm203_vm6, %v204_v9, %v202_v11  ;;  %v223_v15 = vsel %vm222_vm7, %v191_v56, %v221_v10 }
 0x128   :  { %v207_v16 = vmul.f32 %v296_v13, %v189_v59  ;;  %v226_v17 = vsel %vm224_vm8, %v225_v12, %v223_v15  ;;  %228 = vst [vmem:[#allocation7 + $0x8] sm:$0xff] %v205_v14 }
 0x129   :  { %231 = vst [vmem:[#allocation7 + $0x20] sm:$0xff] %v226_v17 }
 0x12a   :  { %v209_v19 = vsel %vm208_vm9, %v189_v59, %v207_v16 }
 0x12b   :  { %v212_v20 = vsel %vm210_vm10, %v211_v18, %v209_v19 }
 0x12c   :  { %229 = vst [vmem:[#allocation7 + $0x10] sm:$0xff] %v212_v20 }
 0x12d   :  { %352 = shalt.err (!%p349_p6)
}
 0x12e   :  { %s353_s12 = scalar_lea.hbm %s436_s2, 640 }
 0x12f   :  { %p354_p7 = scmp.ne.s32.totalorder %s436_s2, %s353_s12  ;;  %p357_p8 = scmp.lt.u32.totalorder %s353_s12, %s436_s2 }
 0x131   :  { %p359_p9 = pnand %p357_p8, %p354_p7 }
 0x133   :  { %362 = shalt.err (!%p359_p9)
}
 0x134   :  { %243 = dma.vmem_to_hbm [thread:$0]  %s238_s8, 640, %s436_s2, [#allocation4], %s370_s19, %s370_s19, %s371_s20  }
 0x135   :  { %367 = dma.done.wait [#allocation4], 640  }
 0x136   :  { %368 = vsyncadd [#allocation4], 4294966656 }
 0x137   :  { %247 = vsyncpa [#allocation3], 1 }
 0x138   :  { %248 = vsyncpa [#allocation6], 1 }
 0x139   :  { %249 = vsyncpa [#allocation4], 1 }

</bundles_post_ra>
